<compile_context>
chip_gen: v7x
topology: tpu7x:2x2x1
jax: 0.10.0
libtpu: 0.0.40
codegen_flags: <defaults>
</compile_context>

<pallas_src>
import jax
import jax.numpy as jnp
from jax.experimental import pallas as pl
from jax.experimental.pallas import tpu as pltpu

IN_DIM = 28 * 28    # 784
IN_PAD = 896        # 7 * 128 : lane-dense K for the first matmul
H1 = 128
H2 = 64
H2_PAD = 128        # lane-dense hidden
OUT = 10
OUT_PAD = 128       # lane-dense output stores


def _round_up(n, m):
    return ((n + m - 1) // m) * m


def _mlp_kernel(x_ref, w1_ref, b1_ref, w2_ref, b2_ref, w3_ref, b3_ref, o_ref):
    # fc1 + ReLU: bf16 operands on the MXU, f32 accumulation.
    h1 = jnp.dot(x_ref[...], w1_ref[...], preferred_element_type=jnp.float32) + b1_ref[...]
    h1 = jnp.maximum(h1, 0.0).astype(jnp.bfloat16)
    # fc2 + ReLU (padded output columns carry zero weights/bias -> ReLU keeps them zero).
    h2 = jnp.dot(h1, w2_ref[...], preferred_element_type=jnp.float32) + b2_ref[...]
    h2 = jnp.maximum(h2, 0.0).astype(jnp.bfloat16)
    # fc3 (no activation); lane-dense padded output, real logits live in [:, :OUT].
    o_ref[...] = (jnp.dot(h2, w3_ref[...], preferred_element_type=jnp.float32)
                  + b3_ref[...]).astype(o_ref.dtype)


def _pad_params(params):
    """Zero-pad params to lane-dense shapes; weights -> bf16, biases stay f32."""
    w1, b1, w2, b2, w3, b3 = params
    w1p = jnp.zeros((IN_PAD, H1), jnp.bfloat16).at[:IN_DIM, :].set(w1.astype(jnp.bfloat16))
    b1p = b1.astype(jnp.float32)                                                  # (1, 128)
    w2p = jnp.zeros((H1, H2_PAD), jnp.bfloat16).at[:, :H2].set(w2.astype(jnp.bfloat16))
    b2p = jnp.zeros((1, H2_PAD), jnp.float32).at[:, :H2].set(b2)
    w3p = jnp.zeros((H2_PAD, OUT_PAD), jnp.bfloat16).at[:H2, :OUT].set(w3.astype(jnp.bfloat16))
    b3p = jnp.zeros((1, OUT_PAD), jnp.float32).at[:, :OUT].set(b3)
    return w1p, b1p, w2p, b2p, w3p, b3p


def feedforward_network(x_nchw, params, *, block_batch=512):
    """x_nchw: (batch, 1, 28, 28) float32 -> (batch, 10) float32.

    block_batch: batch tile size. Sweep 1024-2048 on v5e/v6e (128 MiB VMEM),
    512-1024 on v7x (64 MiB VMEM, 2 TensorCores).
    """
    w1p, b1p, w2p, b2p, w3p, b3p = _pad_params(params)

    batch = x_nchw.shape[0]
    x = x_nchw.reshape(batch, -1).astype(jnp.bfloat16)        # nn.Flatten() + bf16 streaming

    # Batch tile: multiple of 8 (sublane), padded batch a multiple of the tile.
    tb = min(block_batch, _round_up(batch, 8))
    batch_p = _round_up(batch, tb)
    x = jnp.pad(x, ((0, batch_p - batch), (0, IN_PAD - IN_DIM)))
    num_tiles = batch_p // tb

    flops = 2 * batch_p * (IN_PAD * H1 + H1 * H2_PAD + H2_PAD * OUT_PAD)
    bytes_accessed = (batch_p * IN_PAD * 2                                         # x (bf16)
                      + (IN_PAD * H1 + H1 * H2_PAD + H2_PAD * OUT_PAD) * 2         # weights (bf16)
                      + (H1 + H2_PAD + OUT_PAD) * 4                                # biases (f32)
                      + batch_p * OUT_PAD * 4)                                     # output (f32)
    cost = pl.CostEstimate(flops=flops, transcendentals=0, bytes_accessed=bytes_accessed)

    row_spec = lambda shape: pl.BlockSpec(shape, lambda i: (i, 0))     # batch-tiled
    const_spec = lambda shape: pl.BlockSpec(shape, lambda i: (0, 0))   # resident weights/biases

    out = pl.pallas_call(
        _mlp_kernel,
        out_shape=jax.ShapeDtypeStruct((batch_p, OUT_PAD), jnp.float32),
        grid=(num_tiles,),
        in_specs=[
            row_spec((tb, IN_PAD)),
            const_spec((IN_PAD, H1)),      const_spec((1, H1)),
            const_spec((H1, H2_PAD)),      const_spec((1, H2_PAD)),
            const_spec((H2_PAD, OUT_PAD)), const_spec((1, OUT_PAD)),
        ],
        out_specs=row_spec((tb, OUT_PAD)),
        compiler_params=pltpu.CompilerParams(dimension_semantics=("parallel",)),
        cost_estimate=cost,
    )(x, w1p, b1p, w2p, b2p, w3p, b3p)

    return out[:batch, :OUT]


def init_params(key):
    """Deterministic init mirroring torch.nn.Linear default (U[-1/sqrt(fan_in), 1/sqrt(fan_in)])."""
    ks = jax.random.split(key, 6)

    def linear(kw, kb, fan_in, fan_out):
        bound = 1.0 / jnp.sqrt(fan_in)
        w = jax.random.uniform(kw, (fan_in, fan_out), jnp.float32, -bound, bound)
        b = jax.random.uniform(kb, (1, fan_out), jnp.float32, -bound, bound)
        return w, b

    w1, b1 = linear(ks[0], ks[1], IN_DIM, H1)
    w2, b2 = linear(ks[2], ks[3], H1, H2)
    w3, b3 = linear(ks[4], ks[5], H2, OUT)
    return (w1, b1, w2, b2, w3, b3)


def _reference(x_nchw, params):
    """Pure-JAX reference using the same bf16-operand / f32-accumulate math as the kernel."""
    w1, b1, w2, b2, w3, b3 = params
    x = x_nchw.reshape(x_nchw.shape[0], -1).astype(jnp.bfloat16)
    h1 = jnp.dot(x, w1.astype(jnp.bfloat16), preferred_element_type=jnp.float32) + b1
    h1 = jnp.maximum(h1, 0.0).astype(jnp.bfloat16)
    h2 = jnp.dot(h1, w2.astype(jnp.bfloat16), preferred_element_type=jnp.float32) + b2
    h2 = jnp.maximum(h2, 0.0).astype(jnp.bfloat16)
    return jnp.dot(h2, w3.astype(jnp.bfloat16), preferred_element_type=jnp.float32) + b3


if __name__ == "__main__":
    key = jax.random.PRNGKey(0)
    k_param, k_x = jax.random.split(key)
    params = init_params(k_param)
    x = jax.random.normal(k_x, (2, 1, 28, 28), jnp.float32)  # batch=2, NCHW as in the module

    y = feedforward_network(x, params)
    jax.block_until_ready(y)

    y_ref = _reference(x, params)
    assert y.shape == (2, 10), y.shape
    assert jnp.allclose(y, y_ref, atol=1e-3, rtol=1e-3), float(jnp.max(jnp.abs(y - y_ref)))
    print("KERNEL_OK")
</pallas_src>

<mosaic_0001>
module attributes {stable_mosaic.version = 11 : i64} {
  func.func @_mlp_kernel(%arg0: i32, %arg1: memref<8x896xbf16, #tpu.memory_space<vmem>>, %arg2: memref<896x128xbf16, #tpu.memory_space<vmem>>, %arg3: memref<1x128xf32, #tpu.memory_space<vmem>>, %arg4: memref<128x128xbf16, #tpu.memory_space<vmem>>, %arg5: memref<1x128xf32, #tpu.memory_space<vmem>>, %arg6: memref<128x128xbf16, #tpu.memory_space<vmem>>, %arg7: memref<1x128xf32, #tpu.memory_space<vmem>>, %arg8: memref<8x128xf32, #tpu.memory_space<vmem>>) attributes {dimension_semantics = [#tpu.dimension_semantics<parallel>], iteration_bounds = array<i64: 1>, scalar_prefetch = 0 : i64, scratch_operands = 0 : i64, tpu.core_type = #tpu.core_type<tc>, window_params = [{transform_indices = @transform_0, window_bounds = array<i64: 8, 896>}, {pipeline_mode = #tpu.pipeline_mode<synchronous>, transform_indices = @transform_1, window_bounds = array<i64: 896, 128>}, {pipeline_mode = #tpu.pipeline_mode<synchronous>, transform_indices = @transform_2, window_bounds = array<i64: 1, 128>}, {pipeline_mode = #tpu.pipeline_mode<synchronous>, transform_indices = @transform_3, window_bounds = array<i64: 128, 128>}, {pipeline_mode = #tpu.pipeline_mode<synchronous>, transform_indices = @transform_4, window_bounds = array<i64: 1, 128>}, {pipeline_mode = #tpu.pipeline_mode<synchronous>, transform_indices = @transform_5, window_bounds = array<i64: 128, 128>}, {pipeline_mode = #tpu.pipeline_mode<synchronous>, transform_indices = @transform_6, window_bounds = array<i64: 1, 128>}, {transform_indices = @transform_7, window_bounds = array<i64: 8, 128>}]} {
    %c0 = arith.constant 0 : index
    %c0_0 = arith.constant 0 : index
    %0 = vector.load %arg1[%c0, %c0_0] : memref<8x896xbf16, #tpu.memory_space<vmem>>, vector<8x896xbf16>
    %c0_1 = arith.constant 0 : index
    %c0_2 = arith.constant 0 : index
    %1 = vector.load %arg2[%c0_1, %c0_2] : memref<896x128xbf16, #tpu.memory_space<vmem>>, vector<896x128xbf16>
    %cst = arith.constant dense<0.000000e+00> : vector<8x128xf32>
    %2 = tpu.matmul %0, %1, %cst {dimension_numbers = #tpu.dot_dimension_numbers<[1], [0], [0], [1], [0, 0, 1, 1], [], []>} : vector<8x896xbf16>, vector<896x128xbf16>, vector<8x128xf32> -> vector<8x128xf32>
    %c0_3 = arith.constant 0 : index
    %c0_4 = arith.constant 0 : index
    %3 = vector.load %arg3[%c0_3, %c0_4] : memref<1x128xf32, #tpu.memory_space<vmem>>, vector<1x128xf32>
    %4 = vector.broadcast %3 : vector<1x128xf32> to vector<8x128xf32>
    %5 = arith.addf %2, %4 : vector<8x128xf32>
    %cst_5 = arith.constant 0.000000e+00 : f32
    %6 = vector.broadcast %cst_5 : f32 to vector<8x128xf32>
    %7 = arith.maximumf %5, %6 : vector<8x128xf32>
    %8 = arith.truncf %7 : vector<8x128xf32> to vector<8x128xbf16>
    %c0_6 = arith.constant 0 : index
    %c0_7 = arith.constant 0 : index
    %9 = vector.load %arg4[%c0_6, %c0_7] : memref<128x128xbf16, #tpu.memory_space<vmem>>, vector<128x128xbf16>
    %cst_8 = arith.constant dense<0.000000e+00> : vector<8x128xf32>
    %10 = tpu.matmul %8, %9, %cst_8 {dimension_numbers = #tpu.dot_dimension_numbers<[1], [0], [0], [1], [0, 0, 1, 1], [], []>} : vector<8x128xbf16>, vector<128x128xbf16>, vector<8x128xf32> -> vector<8x128xf32>
    %c0_9 = arith.constant 0 : index
    %c0_10 = arith.constant 0 : index
    %11 = vector.load %arg5[%c0_9, %c0_10] : memref<1x128xf32, #tpu.memory_space<vmem>>, vector<1x128xf32>
    %12 = vector.broadcast %11 : vector<1x128xf32> to vector<8x128xf32>
    %13 = arith.addf %10, %12 : vector<8x128xf32>
    %cst_11 = arith.constant 0.000000e+00 : f32
    %14 = vector.broadcast %cst_11 : f32 to vector<8x128xf32>
    %15 = arith.maximumf %13, %14 : vector<8x128xf32>
    %16 = arith.truncf %15 : vector<8x128xf32> to vector<8x128xbf16>
    %c0_12 = arith.constant 0 : index
    %c0_13 = arith.constant 0 : index
    %17 = vector.load %arg6[%c0_12, %c0_13] : memref<128x128xbf16, #tpu.memory_space<vmem>>, vector<128x128xbf16>
    %cst_14 = arith.constant dense<0.000000e+00> : vector<8x128xf32>
    %18 = tpu.matmul %16, %17, %cst_14 {dimension_numbers = #tpu.dot_dimension_numbers<[1], [0], [0], [1], [0, 0, 1, 1], [], []>} : vector<8x128xbf16>, vector<128x128xbf16>, vector<8x128xf32> -> vector<8x128xf32>
    %c0_15 = arith.constant 0 : index
    %c0_16 = arith.constant 0 : index
    %19 = vector.load %arg7[%c0_15, %c0_16] : memref<1x128xf32, #tpu.memory_space<vmem>>, vector<1x128xf32>
    %20 = vector.broadcast %19 : vector<1x128xf32> to vector<8x128xf32>
    %21 = arith.addf %18, %20 : vector<8x128xf32>
    %c0_17 = arith.constant 0 : index
    %c0_18 = arith.constant 0 : index
    %22 = vector.load %arg8[%c0_17, %c0_18] : memref<8x128xf32, #tpu.memory_space<vmem>>, vector<8x128xf32>
    tpu.vector_store %arg8[%c0_17, %c0_18], %21 {strides = array<i32>} : memref<8x128xf32, #tpu.memory_space<vmem>>, vector<8x128xf32>,
    return
  }
  func.func @transform_0(%arg0: i32) -> (i32, i32) {
    %c0_i32 = arith.constant 0 : i32
    %c0_i32_0 = arith.constant 0 : i32
    return %arg0, %c0_i32 : i32, i32
  }
  func.func @transform_1(%arg0: i32) -> (i32, i32) {
    %c0_i32 = arith.constant 0 : i32
    %c0_i32_0 = arith.constant 0 : i32
    %c0_i32_1 = arith.constant 0 : i32
    return %c0_i32, %c0_i32_0 : i32, i32
  }
  func.func @transform_2(%arg0: i32) -> (i32, i32) {
    %c0_i32 = arith.constant 0 : i32
    %c0_i32_0 = arith.constant 0 : i32
    %c0_i32_1 = arith.constant 0 : i32
    return %c0_i32, %c0_i32_0 : i32, i32
  }
  func.func @transform_3(%arg0: i32) -> (i32, i32) {
    %c0_i32 = arith.constant 0 : i32
    %c0_i32_0 = arith.constant 0 : i32
    %c0_i32_1 = arith.constant 0 : i32
    return %c0_i32, %c0_i32_0 : i32, i32
  }
  func.func @transform_4(%arg0: i32) -> (i32, i32) {
    %c0_i32 = arith.constant 0 : i32
    %c0_i32_0 = arith.constant 0 : i32
    %c0_i32_1 = arith.constant 0 : i32
    return %c0_i32, %c0_i32_0 : i32, i32
  }
  func.func @transform_5(%arg0: i32) -> (i32, i32) {
    %c0_i32 = arith.constant 0 : i32
    %c0_i32_0 = arith.constant 0 : i32
    %c0_i32_1 = arith.constant 0 : i32
    return %c0_i32, %c0_i32_0 : i32, i32
  }
  func.func @transform_6(%arg0: i32) -> (i32, i32) {
    %c0_i32 = arith.constant 0 : i32
    %c0_i32_0 = arith.constant 0 : i32
    %c0_i32_1 = arith.constant 0 : i32
    return %c0_i32, %c0_i32_0 : i32, i32
  }
  func.func @transform_7(%arg0: i32) -> (i32, i32) {
    %c0_i32 = arith.constant 0 : i32
    %c0_i32_0 = arith.constant 0 : i32
    return %arg0, %c0_i32 : i32, i32
  }
}

</mosaic_0001>

<bundles_post_ra>
// kernel: tpu_custom_call.1
= control target key start
LH: loop header
LB: loop body
LE: loop exit
PB: predicated region body
PF: predicated region fallthrough
CT: control target
= control target key end

     0   :  { %12 = vsyncpa [#allocation3], 0  ;;  %s1567_s0 = inlined_call_operand.hbm [shape: bf16[8,896], index: 0, kind: input, shape index: {}]   ;;  %s1568_s1 = inlined_call_operand.hbm [shape: bf16[896,128], index: 1, kind: input, shape index: {}]   ;;  %s1569_s2 = inlined_call_operand.vmem [shape: f32[1,128], index: 2, kind: input, shape index: {}]   ;;  %s1570_s3 = inlined_call_operand.hbm [shape: bf16[128,128], index: 3, kind: input, shape index: {}]   ;;  %s1571_s4 = inlined_call_operand.vmem [shape: f32[1,128], index: 4, kind: input, shape index: {}]   ;;  %s1572_s5 = inlined_call_operand.hbm [shape: bf16[128,128], index: 5, kind: input, shape index: {}]   ;;  %s1573_s6 = inlined_call_operand.vmem [shape: f32[1,128], index: 6, kind: input, shape index: {}]   ;;  %s1574_s7 = inlined_call_operand.hbm [shape: f32[8,128], index: 7, kind: output, shape index: {}]  }
   0x1   :  { %13 = vsyncpa [#allocation6], 0 }
   0x2   :  { %14 = vsyncpa [#allocation9], 0 }
   0x3   :  { %15 = vsyncpa [#allocation4], 0  ;;  %s1410_s24 = smov [#allocation5]   ;;  %s1292_s28 = scalar_lea.hbm %s1568_s1, 7168 }
   0x4   :  { %s31_s25 = sshll.u32 %s1410_s24, 4  ;;  %p1293_p0 = scmp.ne.s32.totalorder %s1568_s1, %s1292_s28  ;;  %s32_s25 = int_to_ptr.vmem [resolvable:$true] %s31_s25 }
   0x5   :  { %p1296_p1 = scmp.lt.u32.totalorder %s1292_s28, %s1568_s1 }
   0x7   :  { %p1298_p2 = pnand %p1296_p1, %p1293_p0 }
   0x9   :  { %1301 = shalt.err (!%p1298_p2)
}
   0xa   :  { %s1302_s10 = scalar_lea.vmem %s32_s25, 7168  ;;  %p1307_p4 = scmp.lt.s32.totalorder %s32_s25, %s32_s25 }
   0xb   :  { %p1303_p3 = scmp.ne.s32.totalorder %s32_s25, %s1302_s10  ;;  %p1308_p5 = scmp.lt.s32.totalorder %s1302_s10, %s1302_s10 }
   0xd   :  { %p1309_p6 = por %p1308_p5, %p1307_p4 }
   0xf   :  { %p1310_p7 = pnand %p1309_p6, %p1303_p3 }
  0x11   :  { %1313 = shalt.err (!%p1310_p7)
}
  0x12   :  { %s1411_s11 = smov 64   ;;  %s1412_s12 = smov 4  }
  0x13   :  { %37 = dma.hbm_to_vmem [thread:$0]  %s1568_s1, 7168, %s32_s25, [#allocation6], %s1411_s11, %s1411_s11, %s1412_s12  }
  0x14   :  { %s1413_s15 = smov [#allocation2]   ;;  %s1414_s17 = smov [#allocation7]  }
  0x15   :  { %s22_s16 = sshll.u32 %s1413_s15, 4  ;;  %s45_s18 = sshll.u32 %s1414_s17, 4  ;;  %s23_s16 = int_to_ptr.vmem [resolvable:$true] %s22_s16  ;;  %s46_s18 = int_to_ptr.vmem [resolvable:$true] %s45_s18 }
  0x16   :  { %s1314_s21 = scalar_lea.hbm %s1567_s0, 448 }
  0x17   :  { %p1315_p8 = scmp.ne.s32.totalorder %s1567_s0, %s1314_s21  ;;  %p1318_p9 = scmp.lt.u32.totalorder %s1314_s21, %s1567_s0 }
  0x19   :  { %p1320_p10 = pnand %p1318_p9, %p1315_p8 }
  0x1b   :  { %1323 = shalt.err (!%p1320_p10)
}
  0x1c   :  { %s1324_s1 = scalar_lea.vmem %s23_s16, 448  ;;  %p1329_p12 = scmp.lt.s32.totalorder %s23_s16, %s23_s16 }
  0x1d   :  { %p1325_p11 = scmp.ne.s32.totalorder %s23_s16, %s1324_s1  ;;  %p1330_p13 = scmp.lt.s32.totalorder %s1324_s1, %s1324_s1 }
  0x1f   :  { %p1331_p0 = por %p1330_p13, %p1329_p12 }
  0x21   :  { %p1332_p1 = pnand %p1331_p0, %p1325_p11 }
  0x23   :  { %1335 = shalt.err (!%p1332_p1)
}
  0x24   :  { %25 = dma.hbm_to_vmem [thread:$0]  %s1567_s0, 448, %s23_s16, [#allocation3]  }
  0x25   :  { %s1336_s30 = scalar_lea.hbm %s1570_s3, 1024 }
  0x26   :  { %p1337_p2 = scmp.ne.s32.totalorder %s1570_s3, %s1336_s30  ;;  %p1340_p3 = scmp.lt.u32.totalorder %s1336_s30, %s1570_s3 }
  0x28   :  { %p1342_p4 = pnand %p1340_p3, %p1337_p2 }
  0x2a   :  { %1345 = shalt.err (!%p1342_p4)
}
  0x2b   :  { %s1346_s14 = scalar_lea.vmem %s46_s18, 1024  ;;  %p1351_p6 = scmp.lt.s32.totalorder %s46_s18, %s46_s18 }
  0x2c   :  { %p1347_p5 = scmp.ne.s32.totalorder %s46_s18, %s1346_s14  ;;  %p1352_p7 = scmp.lt.s32.totalorder %s1346_s14, %s1346_s14 }
  0x2e   :  { %p1353_p8 = por %p1352_p7, %p1351_p6 }
  0x30   :  { %p1354_p9 = pnand %p1353_p8, %p1347_p5 }
  0x32   :  { %1357 = shalt.err (!%p1354_p9)
}
  0x33   :  { %51 = dma.hbm_to_vmem [thread:$0]  %s1570_s3, 1024, %s46_s18, [#allocation6], %s1411_s11, %s1411_s11, %s1412_s12  }
  0x34   :  { %s1415_s16 = smov [#allocation8]   ;;  %s1358_s21 = scalar_lea.hbm %s1572_s5, 1024 }
  0x35   :  { %s59_s17 = sshll.u32 %s1415_s16, 4  ;;  %p1359_p10 = scmp.ne.s32.totalorder %s1572_s5, %s1358_s21  ;;  %s60_s17 = int_to_ptr.vmem [resolvable:$true] %s59_s17 }
  0x36   :  { %p1362_p11 = scmp.lt.u32.totalorder %s1358_s21, %s1572_s5 }
  0x38   :  { %p1364_p12 = pnand %p1362_p11, %p1359_p10 }
  0x3a   :  { %1367 = shalt.err (!%p1364_p12)
}
  0x3b   :  { %s1368_s1 = scalar_lea.vmem %s60_s17, 1024  ;;  %p1373_p0 = scmp.lt.s32.totalorder %s60_s17, %s60_s17 }
  0x3c   :  { %p1369_p13 = scmp.ne.s32.totalorder %s60_s17, %s1368_s1  ;;  %p1374_p1 = scmp.lt.s32.totalorder %s1368_s1, %s1368_s1 }
  0x3e   :  { %p1375_p2 = por %p1374_p1, %p1373_p0 }
  0x40   :  { %p1376_p3 = pnand %p1375_p2, %p1369_p13 }
  0x42   :  { %1379 = shalt.err (!%p1376_p3)
}
  0x43   :  { %65 = dma.hbm_to_vmem [thread:$0]  %s1572_s5, 1024, %s60_s17, [#allocation9], %s1411_s11, %s1411_s11, %s1412_s12  }
  0x44   :  { %1402 = dma.done.wait [#allocation3], 448  }
  0x45   :  { %1403 = vsyncadd [#allocation3], 4294966848 }
  0x46   :  { %1404 = dma.done.wait [#allocation6], 8192  }
  0x47   :  { %1405 = vsyncadd [#allocation6], 4294959104 }
  0x48   :  { %1406 = dma.done.wait [#allocation9], 1024  }
  0x49   :  { %1407 = vsyncadd [#allocation9], 4294966272  ;;  %v1213_v0 = vld [vmem:[#allocation5 + $0x40] sm:$0xff]   ;;  %v1217_v4 = vld [vmem:[#allocation5 + $0x48] sm:$0xff]   ;;  %v1416_v42 = vmov 0.0   ;;  %vm1417_vm0 = vmmov 0  }
  0x4a   :  { %v1214_v1 = vld [vmem:[#allocation5] sm:$0xff]   ;;  %1051 = vmatprep.subr.bf16.mxu0 %v1213_v0  ;;  %v1218_v5 = vld [vmem:[#allocation5 + $0x8] sm:$0xff]   ;;  %v1221_v8 = vld [vmem:[#allocation5 + $0x50] sm:$0xff]   ;;  %s1418_s28 = smov [#allocation10]  }
  0x4b   :  { %v1215_v2 = vld [vmem:[#allocation5 + $0xc0] sm:$0xff]   ;;  %1052 = vmatpush3.bf16.msra.mxu0 %v1214_v1  ;;  %v1219_v6 = vld [vmem:[#allocation5 + $0xc8] sm:$0xff]   ;;  %v1222_v9 = vld [vmem:[#allocation5 + $0x10] sm:$0xff]   ;;  %s958_s29 = sshll.u32 %s1418_s28, 4  ;;  %s959_s29 = int_to_ptr.vmem [resolvable:$true] %s958_s29 }
  0x4c   :  { %v1216_v3 = vld [vmem:[#allocation5 + $0x80] sm:$0xff]   ;;  %1073 = vmatprep.subr.bf16.mxu1 %v1215_v2  ;;  %1053 = vmatprep.subr.bf16.mxu0 %v1217_v4  ;;  %v1220_v7 = vld [vmem:[#allocation5 + $0x88] sm:$0xff]   ;;  %v1223_v10 = vld [vmem:[#allocation5 + $0xd0] sm:$0xff]   ;;  %p1385_p5 = scmp.lt.s32.totalorder %s959_s29, %s959_s29 }
  0x4d   :  { %1074 = vmatpush3.bf16.msra.mxu1 %v1216_v3  ;;  %v1224_v11 = vld [vmem:[#allocation5 + $0x90] sm:$0xff]   ;;  %v1225_v12 = vld [vmem:[#allocation5 + $0x58] sm:$0xff]   ;;  %v1229_v16 = vld [vmem:[#allocation5 + $0x60] sm:$0xff]  }
  0x4e   :  { %1075 = vmatprep.subr.bf16.mxu1 %v1219_v6  ;;  %v1226_v13 = vld [vmem:[#allocation5 + $0x18] sm:$0xff]   ;;  %v1230_v17 = vld [vmem:[#allocation5 + $0x20] sm:$0xff]   ;;  %v1233_v20 = vld [vmem:[#allocation5 + $0x68] sm:$0xff]  }
  0x4f   :  { %1054 = vmatpush3.bf16.msra.mxu0 %v1218_v5  ;;  %v1227_v14 = vld [vmem:[#allocation5 + $0xd8] sm:$0xff]   ;;  %v1231_v18 = vld [vmem:[#allocation5 + $0xe0] sm:$0xff]   ;;  %v1234_v21 = vld [vmem:[#allocation5 + $0x28] sm:$0xff]  }
  0x50   :  { %1055 = vmatprep.subr.bf16.mxu0 %v1221_v8  ;;  %v1228_v15 = vld [vmem:[#allocation5 + $0x98] sm:$0xff]   ;;  %v1232_v19 = vld [vmem:[#allocation5 + $0xa0] sm:$0xff]   ;;  %v1235_v22 = vld [vmem:[#allocation5 + $0xe8] sm:$0xff]  }
  0x51   :  { %1076 = vmatpush3.bf16.msra.mxu1 %v1220_v7  ;;  %v1236_v23 = vld [vmem:[#allocation5 + $0xa8] sm:$0xff]   ;;  %v1237_v24 = vld [vmem:[#allocation5 + $0x70] sm:$0xff]   ;;  %v1241_v28 = vld [vmem:[#allocation5 + $0x78] sm:$0xff]  }
  0x52   :  { %1077 = vmatprep.subr.bf16.mxu1 %v1223_v10  ;;  %v1238_v25 = vld [vmem:[#allocation5 + $0x30] sm:$0xff]   ;;  %v1242_v29 = vld [vmem:[#allocation5 + $0x38] sm:$0xff]   ;;  %v81_v31 = vld [vmem:[#allocation2] sm:$0xff] }
  0x53   :  { %1056 = vmatpush3.bf16.msra.mxu0 %v1222_v9  ;;  %v1239_v26 = vld [vmem:[#allocation5 + $0xf0] sm:$0xff]   ;;  %v1243_v30 = vld [vmem:[#allocation5 + $0xf8] sm:$0xff]   ;;  %v970_v32 = vcombine.low %v81_v31, %v81_v31  ;;  %v971_v33 = vcombine.high %v81_v31, %v81_v31  ;;  %v1247_v35 = vld [vmem:[#allocation5 + $0x140] sm:$0xff]  }
  0x54   :  { %1057 = vmatprep.subr.bf16.mxu0 %v1225_v12  ;;  %v1240_v27 = vld [vmem:[#allocation5 + $0xb0] sm:$0xff]   ;;  %v1246_v34 = vld [vmem:[#allocation5 + $0xb8] sm:$0xff]   ;;  %v1250_v39 = vld [vmem:[#allocation5 + $0x100] sm:$0xff]  }
  0x55   :  { %1078 = vmatpush3.bf16.msra.mxu1 %v1224_v11  ;;  %v82_v36 = vld [vmem:[#allocation2 + $0x8] sm:$0xff]  ;;  %597 = vmatprep.mubr.bf16.mxu0 %v971_v33  ;;  %v1251_v40 = vld [vmem:[#allocation5 + $0x180] sm:$0xff]   ;;  %v1258_v48 = vld [vmem:[#allocation5 + $0x158] sm:$0xff]  }
  0x56   :  { %1079 = vmatprep.subr.bf16.mxu1 %v1227_v14  ;;  %v972_v37 = vcombine.low %v82_v36, %v82_v36  ;;  %v973_v38 = vcombine.high %v82_v36, %v82_v36  ;;  %v1252_v41 = vld [vmem:[#allocation5 + $0x148] sm:$0xff]   ;;  %v1255_v45 = vld [vmem:[#allocation5 + $0x150] sm:$0xff]   ;;  %v1259_v49 = vld [vmem:[#allocation5 + $0x118] sm:$0xff]  }
  0x57   :  { %1058 = vmatpush3.bf16.msra.mxu0 %v1226_v13  ;;  %v1253_v43 = vld [vmem:[#allocation5 + $0x108] sm:$0xff]   ;;  %v1256_v46 = vld [vmem:[#allocation5 + $0x110] sm:$0xff]   ;;  %v1261_v50 = vld [vmem:[#allocation5 + $0x160] sm:$0xff]  }
  0x58   :  { %1059 = vmatprep.subr.bf16.mxu0 %v1229_v16  ;;  %637 = vmatprep.mubr.bf16.mxu1 %v973_v38  ;;  %v1254_v44 = vld [vmem:[#allocation5 + $0x188] sm:$0xff]   ;;  %v1257_v47 = vld [vmem:[#allocation5 + $0x190] sm:$0xff]   ;;  %v1260_v51 = vld [vmem:[#allocation5 + $0x198] sm:$0xff]  }
  0x59   :  { %1080 = vmatpush3.bf16.msra.mxu1 %v1228_v15  ;;  %v1262_v52 = vld [vmem:[#allocation5 + $0x120] sm:$0xff]   ;;  %v1264_v53 = vld [vmem:[#allocation5 + $0x168] sm:$0xff]   ;;  %v1267_v56 = vld [vmem:[#allocation5 + $0x170] sm:$0xff]  }
  0x5a   :  { %1081 = vmatprep.subr.bf16.mxu1 %v1231_v18  ;;  %v1263_v54 = vld [vmem:[#allocation5 + $0x1a0] sm:$0xff]   ;;  %v1265_v55 = vld [vmem:[#allocation5 + $0x128] sm:$0xff]   ;;  %v1268_v58 = vld [vmem:[#allocation5 + $0x130] sm:$0xff]  }
  0x5b   :  { %1060 = vmatpush3.bf16.msra.mxu0 %v1230_v17  ;;  %v1266_v57 = vld [vmem:[#allocation5 + $0x1a8] sm:$0xff]   ;;  %v83_v59 = vld [vmem:[#allocation2 + $0x10] sm:$0xff]  ;;  %v1275_v2 = vld [vmem:[#allocation2 + $0x18] ss:$0 sps:$4 sm:$0xff]  }
  0x5c   :  { %1061 = vmatprep.subr.bf16.mxu0 %v1233_v20  ;;  %v1269_v60 = vld [vmem:[#allocation5 + $0x1b0] sm:$0xff]   ;;  %v975_v61 = vcombine.high %v83_v59, %v83_v59  ;;  %v1270_v62 = vld [vmem:[#allocation5 + $0x178] sm:$0xff]   ;;  %v974_v1 = vcombine.low %v83_v59, %v83_v59  ;;  %v1276_v3 = vld [vmem:[#allocation7] sm:$0xff]  }
  0x5d   :  { %1082 = vmatpush3.bf16.msra.mxu1 %v1232_v19  ;;  %v1271_v63 = vld [vmem:[#allocation5 + $0x138] sm:$0xff]   ;;  %v1277_v4 = vld [vmem:[#allocation7 + $0x8] sm:$0xff]   ;;  %v1278_v5 = vld [vmem:[#allocation7 + $0x10] sm:$0xff]  }
  0x5e   :  { %1083 = vmatprep.subr.bf16.mxu1 %v1235_v22  ;;  %v1274_v0 = vld [vmem:[#allocation5 + $0x1b8] sm:$0xff]   ;;  %v1280_v7 = vld [vmem:[#allocation7 + $0x20] sm:$0xff]   ;;  %v1281_v8 = vld [vmem:[#allocation7 + $0x28] sm:$0xff]  }
  0x5f   :  { %1062 = vmatpush3.bf16.msra.mxu0 %v1234_v21  ;;  %v1279_v6 = vld [vmem:[#allocation7 + $0x18] sm:$0xff]   ;;  %v1282_v9 = vld [vmem:[#allocation7 + $0x30] sm:$0xff]   ;;  %v1284_v11 = vld [vmem:[#allocation8] sm:$0xff]  }
  0x60   :  { %1063 = vmatprep.subr.bf16.mxu0 %v1237_v24  ;;  %v1283_v10 = vld [vmem:[#allocation7 + $0x38] sm:$0xff]   ;;  %v1285_v12 = vld [vmem:[#allocation8 + $0x8] sm:$0xff]   ;;  %v1286_v13 = vld [vmem:[#allocation8 + $0x10] sm:$0xff]  }
  0x61   :  { %1084 = vmatpush3.bf16.msra.mxu1 %v1236_v23  ;;  %v1287_v14 = vld [vmem:[#allocation8 + $0x18] sm:$0xff]   ;;  %v1288_v15 = vld [vmem:[#allocation8 + $0x20] sm:$0xff]   ;;  %v1289_v16 = vld [vmem:[#allocation8 + $0x28] sm:$0xff]  }
  0x62   :  { %1085 = vmatprep.subr.bf16.mxu1 %v1239_v26  ;;  %v969_v18 = vld [vmem:[%s1569_s2] ss:$0 sm:$0xff] }
  0x63   :  { %1064 = vmatpush3.bf16.msra.mxu0 %v1238_v25 }
  0x64   :  { %1065 = vmatprep.subr.bf16.mxu0 %v1241_v28 }
  0x65   :  { %1086 = vmatpush3.bf16.msra.mxu1 %v1240_v27 }
  0x66   :  { %1087 = vmatprep.subr.bf16.mxu1 %v1243_v30 }
  0x67   :  { %1066 = vmatpush3.bf16.msra.mxu0 %v1242_v29 }
  0x68   :  { %1095 = vmatprep.subr.bf16.mxu0 %v1247_v35 }
  0x69   :  { %1088 = vmatpush3.bf16.msra.mxu1 %v1246_v34 }
  0x6a   :  { %598 = vmatmul.mubr.bf16.vlgmr.msra.gmra.mrb[0].mxu0 %v970_v32  ;;  %1144 = vmatprep.subr.bf16.mxu1 %v1416_v42 }
  0x6b   :  { %1096 = vmatpush3.bf16.msra.mxu0 %v1250_v39  ;;  %677 = vmatprep.mubr.bf16.mxu0 %v975_v61 }
  0x6c   :  { %638 = vmatmul.mubr.bf16.vlgmr.msra.gmra.mrb[0].mxu1 %v972_v37  ;;  %1097 = vmatprep.subr.bf16.mxu0 %v1252_v41 }
  0x6d   :  { %1145 = vmatpush3.bf16.msra.mxu1 %v1251_v40  ;;  %1160 = vmatprep.mubr.msk.bf16.mxu1 %vm1417_vm0, %v1416_v42 }
  0x6e   :  { %1146 = vmatprep.subr.bf16.mxu1 %v1416_v42 }
  0x6f   :  { %1098 = vmatpush3.bf16.msra.mxu0 %v1253_v43 }
  0x70   :  { %1099 = vmatprep.subr.bf16.mxu0 %v1255_v45  ;;  %v1291_v45 = vld [vmem:[#allocation8 + $0x38] sm:$0xff]  }
  0x71   :  { %1147 = vmatpush3.bf16.msra.mxu1 %v1254_v44  ;;  %v1290_v44 = vld [vmem:[#allocation8 + $0x30] sm:$0xff]  }
  0x72   :  { %1148 = vmatprep.subr.bf16.mxu1 %v1416_v42 }
  0x73   :  { %1100 = vmatpush3.bf16.msra.mxu0 %v1256_v46  ;;  %v1033_v46 = vld [vmem:[%s1571_s4] ss:$0 sm:$0xff]  ;;  %s1380_s4 = scalar_lea.vmem %s959_s29, 128 }
  0x74   :  { %1101 = vmatprep.subr.bf16.mxu0 %v1258_v48  ;;  %p1381_p4 = scmp.ne.s32.totalorder %s959_s29, %s1380_s4  ;;  %p1386_p6 = scmp.lt.s32.totalorder %s1380_s4, %s1380_s4 }
  0x75   :  { %1149 = vmatpush3.bf16.msra.mxu1 %v1257_v47 }
  0x76   :  { %1150 = vmatprep.subr.bf16.mxu1 %v1416_v42  ;;  %p1387_p7 = por %p1386_p6, %p1385_p5 }
  0x77   :  { %1102 = vmatpush3.bf16.msra.mxu0 %v1259_v49 }
  0x78   :  { %1103 = vmatprep.subr.bf16.mxu0 %v1261_v50  ;;  %p1388_p8 = pnand %p1387_p7, %p1381_p4 }
  0x79   :  { %1151 = vmatpush3.bf16.msra.mxu1 %v1260_v51 }
  0x7a   :  { %1152 = vmatprep.subr.bf16.mxu1 %v1416_v42 }
  0x7b   :  { %1104 = vmatpush3.bf16.msra.mxu0 %v1262_v52 }
  0x7c   :  { %1105 = vmatprep.subr.bf16.mxu0 %v1264_v53 }
  0x7d   :  { %1153 = vmatpush3.bf16.msra.mxu1 %v1263_v54  ;;  %v1042_v54 = vld [vmem:[%s1573_s6] ss:$0 sm:$0xff] }
  0x7e   :  { %1154 = vmatprep.subr.bf16.mxu1 %v1416_v42 }
  0x7f   :  { %1106 = vmatpush3.bf16.msra.mxu0 %v1265_v55 }
  0x80   :  { %1107 = vmatprep.subr.bf16.mxu0 %v1267_v56 }
  0x81   :  { %1155 = vmatpush3.bf16.msra.mxu1 %v1266_v57 }
  0x82   :  { %1156 = vmatprep.subr.bf16.mxu1 %v1416_v42 }
  0x83   :  { %1108 = vmatpush3.bf16.msra.mxu0 %v1268_v58 }
  0x84   :  { %1109 = vmatprep.subr.bf16.mxu0 %v1270_v62 }
  0x85   :  { %1157 = vmatpush3.bf16.msra.mxu1 %v1269_v60 }
  0x86   :  { %1158 = vmatprep.subr.bf16.mxu1 %v1416_v42 }
  0x87   :  { %1110 = vmatpush3.bf16.msra.mxu0 %v1271_v63 }
  0x88   :  { %1164 = vmatprep.subr.bf16.mxu0 %v1416_v42 }
  0x89   :  { %1159 = vmatpush3.bf16.msra.mxu1 %v1274_v0 }
  0x8a   :  { %678 = vmatmul.mubr.bf16.vlgmr.msra.gmra.mrb[4].mxu0 %v974_v1  ;;  %1184 = vmatprep.subr.bf16.mxu1 %v1416_v42 }
  0x8b   :  { %1180 = vmatprep.mubr.msk.bf16.mxu0 %vm1417_vm0, %v1416_v42  ;;  %1165 = vmatpush3.bf16.msra.mxu0 %v1276_v3 }
  0x8c   :  { %1161 = vmatmul.mubr.bf16.vlgmr.msra.gmra.mrb[4].mxu1 %v1275_v2  ;;  %1166 = vmatprep.subr.bf16.mxu0 %v1416_v42 }
  0x8d   :  { %1200 = vmatprep.mubr.msk.bf16.mxu1 %vm1417_vm0, %v1416_v42  ;;  %1185 = vmatpush3.bf16.msra.mxu1 %v1284_v11 }
  0x8e   :  { %1186 = vmatprep.subr.bf16.mxu1 %v1416_v42 }
  0x8f   :  { %1167 = vmatpush3.bf16.msra.mxu0 %v1277_v4 }
  0x90   :  { %1168 = vmatprep.subr.bf16.mxu0 %v1416_v42 }
  0x91   :  { %1187 = vmatpush3.bf16.msra.mxu1 %v1285_v12 }
  0x92   :  { %1188 = vmatprep.subr.bf16.mxu1 %v1416_v42 }
  0x93   :  { %1169 = vmatpush3.bf16.msra.mxu0 %v1278_v5 }
  0x94   :  { %1170 = vmatprep.subr.bf16.mxu0 %v1416_v42 }
  0x95   :  { %1189 = vmatpush3.bf16.msra.mxu1 %v1286_v13 }
  0x96   :  { %1190 = vmatprep.subr.bf16.mxu1 %v1416_v42 }
  0x97   :  { %1171 = vmatpush3.bf16.msra.mxu0 %v1279_v6 }
  0x98   :  { %1172 = vmatprep.subr.bf16.mxu0 %v1416_v42 }
  0x99   :  { %1191 = vmatpush3.bf16.msra.mxu1 %v1287_v14 }
  0x9a   :  { %1192 = vmatprep.subr.bf16.mxu1 %v1416_v42 }
  0x9b   :  { %1173 = vmatpush3.bf16.msra.mxu0 %v1280_v7 }
  0x9c   :  { %1174 = vmatprep.subr.bf16.mxu0 %v1416_v42 }
  0x9d   :  { %1193 = vmatpush3.bf16.msra.mxu1 %v1288_v15 }
  0x9e   :  { %1194 = vmatprep.subr.bf16.mxu1 %v1416_v42 }
  0x9f   :  { %1175 = vmatpush3.bf16.msra.mxu0 %v1281_v8 }
  0xa0   :  { %1176 = vmatprep.subr.bf16.mxu0 %v1416_v42 }
  0xa1   :  { %1195 = vmatpush3.bf16.msra.mxu1 %v1289_v16 }
  0xa2   :  { %1196 = vmatprep.subr.bf16.mxu1 %v1416_v42 }
  0xa3   :  { %1177 = vmatpush3.bf16.msra.mxu0 %v1282_v9 }
  0xa4   :  { %1178 = vmatprep.subr.bf16.mxu0 %v1416_v42 }
  0xa5   :  { %1197 = vmatpush3.bf16.msra.mxu1 %v1290_v44 }
  0xa6   :  { %1198 = vmatprep.subr.bf16.mxu1 %v1416_v42 }
  0xa7   :  { %1179 = vmatpush3.bf16.msra.mxu0 %v1283_v10 }
  0xa9   :  { %1199 = vmatpush3.bf16.msra.mxu1 %v1291_v45 }
 0x13d   :  { %v1067_v17 = vpop.f32.mrb[0].mxu0 }
 0x13e   :  { %v1068_v19 = vpop.f32.mrb[1].mxu0 }
 0x13f   :  { %v1069_v20 = vadd.f32 %v1068_v19, %v1067_v17  ;;  %v1070_v21 = vpop.f32.mrb[2].mxu0  ;;  %v1089_v22 = vpop.f32.mrb[0].mxu1 }
 0x140   :  { %v1071_v23 = vpop.f32.mrb[3].mxu0  ;;  %v1090_v24 = vpop.f32.mrb[1].mxu1 }
 0x141   :  { %v600_v25 = vadd.f32 %v1069_v20, %v969_v18  ;;  %v1091_v26 = vadd.f32 %v1090_v24, %v1089_v22  ;;  %v1092_v27 = vpop.f32.mrb[2].mxu1 }
 0x142   :  { %v1093_v28 = vpop.f32.mrb[3].mxu1 }
 0x143   :  { %v640_v29 = vadd.f32 %v1091_v26, %v600_v25 }
 0x15d   :  { %v1111_v30 = vpop.f32.mrb[4].mxu0 }
 0x15e   :  { %v1112_v31 = vpop.f32.mrb[5].mxu0 }
 0x15f   :  { %v1113_v32 = vadd.f32 %v1112_v31, %v1111_v30  ;;  %v1114_v33 = vpop.f32.mrb[6].mxu0  ;;  %v719_v34 = vpop.f32.mrb[4].mxu1 }
 0x160   :  { %v1115_v35 = vpop.f32.mrb[7].mxu0  ;;  %v1162_v36 = vpop.f32.mrb[5].mxu1 }
 0x161   :  { %v680_v37 = vadd.f32 %v1113_v32, %v640_v29  ;;  %v722_v38 = vpop.f32.mrb[6].mxu1 }
 0x162   :  { %v1163_v39 = vpop.f32.mrb[7].mxu1 }
 0x163   :  { %v720_v40 = vadd.f32 %v719_v34, %v680_v37 }
 0x165   :  { %v725_v41 = vmax.f32 %v720_v40, 0.0 }
 0x167   :  { %v726_v43 = vpack.c.bf16 %v725_v41, %v725_v41 }
 0x169   :  { %1181 = vmatmul.mubr.bf16.vlgmr.msra.gmra.mrb[8].mxu0 %v726_v43 }
 0x23c   :  { %v832_v47 = vpop.f32.mrb[8].mxu0 }
 0x23d   :  { %v833_v48 = vadd.f32 %v1033_v46, %v832_v47  ;;  %v1182_v49 = vpop.f32.mrb[9].mxu0 }
 0x23e   :  { %v835_v50 = vpop.f32.mrb[10].mxu0 }
 0x23f   :  { %v838_v51 = vmax.f32 %v833_v48, 0.0  ;;  %v1183_v52 = vpop.f32.mrb[11].mxu0 }
 0x241   :  { %v839_v53 = vpack.c.bf16 %v838_v51, %v838_v51 }
 0x243   :  { %1201 = vmatmul.mubr.bf16.vlgmr.msra.gmra.mrb[8].mxu1 %v839_v53 }
 0x316   :  { %v945_v42 = vpop.f32.mrb[8].mxu1 }
 0x317   :  { %v946_v55 = vadd.f32 %v1042_v54, %v945_v42  ;;  %v1202_v56 = vpop.f32.mrb[9].mxu1 }
 0x318   :  { %v948_v57 = vpop.f32.mrb[10].mxu1 }
 0x319   :  { %951 = vst [vmem:[#allocation10] sm:$0xff] %v946_v55  ;;  %v1203_v58 = vpop.f32.mrb[11].mxu1 }
 0x31a   :  { %1391 = shalt.err (!%p1388_p8)
}
 0x31b   :  { %s1392_s6 = scalar_lea.hbm %s1574_s7, 128 }
 0x31c   :  { %p1393_p9 = scmp.ne.s32.totalorder %s1574_s7, %s1392_s6  ;;  %p1396_p10 = scmp.lt.u32.totalorder %s1392_s6, %s1574_s7 }
 0x31e   :  { %p1398_p11 = pnand %p1396_p10, %p1393_p9 }
 0x320   :  { %1401 = shalt.err (!%p1398_p11)
}
 0x321   :  { %961 = dma.vmem_to_hbm [thread:$0]  %s959_s29, 128, %s1574_s7, [#allocation4]  }
 0x322   :  { %1408 = dma.done.wait [#allocation4], 128  }
 0x323   :  { %1409 = vsyncadd [#allocation4], 4294967168 }
 0x324   :  { %965 = vsyncpa [#allocation3], 1 }
 0x325   :  { %966 = vsyncpa [#allocation6], 1 }
 0x326   :  { %967 = vsyncpa [#allocation9], 1 }
 0x327   :  { %968 = vsyncpa [#allocation4], 1 }

</bundles_post_ra>
